<compile_context>
chip_gen: v6e
topology: v6e:2x2x1
jax: 0.10.0
libtpu: 0.0.40
codegen_flags: <defaults>
</compile_context>

<pallas_src>
import functools
import numpy as np
import jax
import jax.numpy as jnp
from jax.experimental import pallas as pl
from jax.experimental.pallas import tpu as pltpu


# ----------------------------------------------------------------------------- kernel
def swd_kernel(q_ref, rq_ref, k_ref, rk_ref, m_ref, o_ref, *, inv_d):
    # q_ref, rq_ref : (1, 1, TD, Ti) f32 — q values / q ranks for this (feature-chunk,
    #                 query-tile); feature chunk on sublanes, query positions on lanes.
    # k_ref, rk_ref : (1, TD, S)     f32 — k values / k ranks; key positions on lanes.
    # m_ref         : (1, Ti, S)     i8  — attention-mask tile (nonzero == masked).
    # o_ref         : (1, Ti, S)     f32 — output tile, resident across the
    #                 feature-chunk grid axis (accumulator).
    dk = pl.program_id(2)
    n_dk = pl.num_programs(2)

    q = q_ref[0, 0]        # [TD, Ti]
    rq = rq_ref[0, 0]      # [TD, Ti]
    kv = k_ref[0]          # [TD, S]
    rk = rk_ref[0]         # [TD, S]

    # [TD, Ti, S] intermediates: S on lanes, Ti on sublanes, feature chunk on the
    # leading (major) axis so the reduction below lowers to plain vector adds.
    diff = q[:, :, None] - kv[:, None, :]
    w = jnp.exp(-(diff * diff))
    match = rq[:, :, None] == rk[:, None, :]          # exact: ranks are small ints in f32
    contrib = jnp.sum(jnp.where(match, w, jnp.float32(0.0)), axis=0)   # [Ti, S]

    @pl.when(dk == 0)
    def _init():
        o_ref[0] = jnp.zeros_like(contrib)

    o_ref[0] += contrib

    @pl.when(dk == n_dk - 1)
    def _finalize():
        p = o_ref[0] * jnp.float32(inv_d)
        o_ref[0] = jnp.where(m_ref[0] != 0, jnp.float32(0.0), p)


# ----------------------------------------------------------------------------- tiling
def _divisors(n):
    return [d for d in range(1, n + 1) if n % d == 0]


def _pick_tiles(S, D, budget_bytes=12 * 1024 * 1024):
    """Pick (query-tile Ti, feature-chunk TD) so ~5 live f32 [TD, Ti, S] slabs fit a
    conservative VMEM budget (safe on v7x's 64 MiB alongside double-buffered I/O)."""
    ti_cands = sorted({d for d in _divisors(S) if d == S or d % 32 == 0}, reverse=True)
    ti_cands = [t for t in ti_cands if t <= 256] or [min(ti_cands)]
    td_cands = sorted({d for d in _divisors(D) if d == D or d % 8 == 0}, reverse=True)
    for ti in ti_cands:
        for td in td_cands:
            if 5 * 4 * td * ti * S <= budget_bytes:
                return ti, td
    return ti_cands[-1], td_cands[-1]


# ----------------------------------------------------------------------------- wrapper
def swd_pallas(q, k, attn_mask, *, ti=None, td=None):
    """q, k: [..., S, D]; attn_mask: [..., S, S] bool. Returns attn_mask-shaped f32."""
    mask_shape = attn_mask.shape
    S, D = q.shape[-2], q.shape[-1]
    assert k.shape[-2] == S, "SWD requires q and k to have the same sequence length"

    qf = q.reshape(-1, S, D).astype(jnp.float32)
    kf = k.reshape(-1, S, D).astype(jnp.float32)
    mf = attn_mask.reshape(-1, S, S).astype(jnp.int8)     # int8: 4x smaller mask DMA
    BH = qf.shape[0]
    assert mf.shape[0] == BH, "attn_mask batch dims must match q/k batch*heads"

    auto_ti, auto_td = _pick_tiles(S, D)
    Ti = auto_ti if ti is None else ti
    Td = auto_td if td is None else td
    assert S % Ti == 0 and (Ti % 32 == 0 or Ti == S), "bad query tile"
    assert D % Td == 0 and (Td % 8 == 0 or Td == D), "bad feature chunk"
    nI, nD = S // Ti, D // Td

    # Ranks of every element within its feature column along the sequence axis
    # (inverse of the stable per-column argsort == the reference's sort indices).
    # O(BH*S*D*logS) preprocessing, negligible vs the O(BH*S^2*D) kernel work.
    # TODO(synk): torch.sort has no Pallas primitive; ranks come from XLA argsort here.
    rq = jnp.argsort(jnp.argsort(qf, axis=1), axis=1).astype(jnp.float32)
    rk = jnp.argsort(jnp.argsort(kf, axis=1), axis=1).astype(jnp.float32)

    # Layout plumbing: feature chunks on sublanes, sequence on lanes.
    q_t = jnp.transpose(qf.reshape(BH, nI, Ti, D), (0, 1, 3, 2))    # [BH, nI, D, Ti]
    rq_t = jnp.transpose(rq.reshape(BH, nI, Ti, D), (0, 1, 3, 2))   # [BH, nI, D, Ti]
    k_t = jnp.swapaxes(kf, 1, 2)                                    # [BH, D, S]
    rk_t = jnp.swapaxes(rk, 1, 2)                                   # [BH, D, S]

    kernel = functools.partial(swd_kernel, inv_d=1.0 / D)
    out = pl.pallas_call(
        kernel,
        out_shape=jax.ShapeDtypeStruct((BH, S, S), jnp.float32),
        grid=(BH, nI, nD),
        in_specs=[
            pl.BlockSpec((1, 1, Td, Ti), lambda b, i, d: (b, i, d, 0)),   # q tile
            pl.BlockSpec((1, 1, Td, Ti), lambda b, i, d: (b, i, d, 0)),   # q ranks
            pl.BlockSpec((1, Td, S), lambda b, i, d: (b, d, 0)),          # k chunk
            pl.BlockSpec((1, Td, S), lambda b, i, d: (b, d, 0)),          # k ranks
            pl.BlockSpec((1, Ti, S), lambda b, i, d: (b, i, 0)),          # mask tile (i8)
        ],
        out_specs=pl.BlockSpec((1, Ti, S), lambda b, i, d: (b, i, 0)),    # accumulator
        compiler_params=pltpu.CompilerParams(
            dimension_semantics=("parallel", "parallel", "arbitrary"),
            vmem_limit_bytes=48 * 1024 * 1024,
        ),
    )(q_t, rq_t, k_t, rk_t, mf)
    return out.reshape(mask_shape)


# ----------------------------------------------------------------------------- reference
def swd_ref_np(q, k, attn_mask):
    """Direct NumPy transcription of the PyTorch reference (for verification)."""
    qn = np.asarray(q, np.float32).reshape(-1, q.shape[-2], q.shape[-1])
    kn = np.asarray(k, np.float32).reshape(-1, k.shape[-2], k.shape[-1])
    mn = np.asarray(attn_mask).reshape(-1, attn_mask.shape[-2], attn_mask.shape[-1])
    BH, S, D = qn.shape
    Sk = kn.shape[1]
    out = np.zeros((BH, S, Sk), np.float32)
    for b in range(BH):
        q_idx = np.argsort(qn[b], axis=0, kind="stable")
        k_idx = np.argsort(kn[b], axis=0, kind="stable")
        pd = np.zeros((S, Sk), np.float32)
        for d in range(D):
            pi = np.zeros((S, Sk), np.float32)
            pi[q_idx[:, d], k_idx[:, d]] = 1.0
            ci = np.abs(qn[b][:, d][:, None] - kn[b][:, d][None, :]) ** 2
            pd = pd + pi * np.exp(-ci)
        pd = pd / D
        out[b] = np.where(mn[b], 0.0, pd)
    return out.reshape(attn_mask.shape)


# ----------------------------------------------------------------------------- test
if __name__ == "__main__":
    key = jax.random.PRNGKey(0)

    # Config 1: natural small shape (single query tile / feature chunk).
    B, H, S, D = 2, 2, 8, 32
    kq, kk, km, key = jax.random.split(key, 4)
    q = jax.random.normal(kq, (B, H, S, D), dtype=jnp.float32)
    k = jax.random.normal(kk, (B, H, S, D), dtype=jnp.float32)
    attn_mask = jax.random.bernoulli(km, 0.2, (B, H, S, S))      # True == masked out
    out = jax.block_until_ready(swd_pallas(q, k, attn_mask))
    ref = swd_ref_np(np.asarray(q), np.asarray(k), np.asarray(attn_mask))
    np.testing.assert_allclose(np.asarray(out), ref, rtol=1e-4, atol=2e-5)

    # Config 2: forces multiple query tiles (nI=2) and feature chunks (nD=4) so the
    # accumulate / finalize paths across the "arbitrary" grid axis are exercised.
    B2, H2, S2, D2 = 2, 2, 64, 32
    kq2, kk2, km2, _ = jax.random.split(key, 4)
    q2 = jax.random.normal(kq2, (B2, H2, S2, D2), dtype=jnp.float32)
    k2 = jax.random.normal(kk2, (B2, H2, S2, D2), dtype=jnp.float32)
    attn_mask2 = jax.random.bernoulli(km2, 0.2, (B2, H2, S2, S2))
    out2 = jax.block_until_ready(swd_pallas(q2, k2, attn_mask2, ti=32, td=8))
    ref2 = swd_ref_np(np.asarray(q2), np.asarray(k2), np.asarray(attn_mask2))
    np.testing.assert_allclose(np.asarray(out2), ref2, rtol=1e-4, atol=2e-5)

    print("KERNEL_OK")
</pallas_src>

<mosaic_0001>
module attributes {stable_mosaic.version = 11 : i64} {
  func.func @swd_kernel(%arg0: i32, %arg1: i32, %arg2: i32, %arg3: memref<1x1x32x8xf32, #tpu.memory_space<vmem>>, %arg4: memref<1x1x32x8xf32, #tpu.memory_space<vmem>>, %arg5: memref<1x32x8xf32, #tpu.memory_space<vmem>>, %arg6: memref<1x32x8xf32, #tpu.memory_space<vmem>>, %arg7: memref<1x8x8xi8, #tpu.memory_space<vmem>>, %arg8: memref<1x8x8xf32, #tpu.memory_space<vmem>>) attributes {dimension_semantics = [#tpu.dimension_semantics<parallel>, #tpu.dimension_semantics<parallel>, #tpu.dimension_semantics<arbitrary>], iteration_bounds = array<i64: 4, 1, 1>, scalar_prefetch = 0 : i64, scratch_operands = 0 : i64, tpu.core_type = #tpu.core_type<tc>, window_params = [{transform_indices = @transform_0, window_bounds = array<i64: 1, 1, 32, 8>}, {transform_indices = @transform_1, window_bounds = array<i64: 1, 1, 32, 8>}, {transform_indices = @transform_2, window_bounds = array<i64: 1, 32, 8>}, {transform_indices = @transform_3, window_bounds = array<i64: 1, 32, 8>}, {transform_indices = @transform_4, window_bounds = array<i64: 1, 8, 8>}, {transform_indices = @transform_5, window_bounds = array<i64: 1, 8, 8>}]} {
    %c0 = arith.constant 0 : index
    %c0_0 = arith.constant 0 : index
    %c0_1 = arith.constant 0 : index
    %c0_2 = arith.constant 0 : index
    %0 = vector.load %arg3[%c0, %c0_0, %c0_1, %c0_2] : memref<1x1x32x8xf32, #tpu.memory_space<vmem>>, vector<1x1x32x8xf32>
    %1 = vector.shape_cast %0 : vector<1x1x32x8xf32> to vector<32x8xf32>
    %c0_3 = arith.constant 0 : index
    %c0_4 = arith.constant 0 : index
    %c0_5 = arith.constant 0 : index
    %c0_6 = arith.constant 0 : index
    %2 = vector.load %arg4[%c0_3, %c0_4, %c0_5, %c0_6] : memref<1x1x32x8xf32, #tpu.memory_space<vmem>>, vector<1x1x32x8xf32>
    %3 = vector.shape_cast %2 : vector<1x1x32x8xf32> to vector<32x8xf32>
    %c0_7 = arith.constant 0 : index
    %c0_8 = arith.constant 0 : index
    %c0_9 = arith.constant 0 : index
    %4 = vector.load %arg5[%c0_7, %c0_8, %c0_9] : memref<1x32x8xf32, #tpu.memory_space<vmem>>, vector<1x32x8xf32>
    %5 = vector.shape_cast %4 : vector<1x32x8xf32> to vector<32x8xf32>
    %c0_10 = arith.constant 0 : index
    %c0_11 = arith.constant 0 : index
    %c0_12 = arith.constant 0 : index
    %6 = vector.load %arg6[%c0_10, %c0_11, %c0_12] : memref<1x32x8xf32, #tpu.memory_space<vmem>>, vector<1x32x8xf32>
    %7 = vector.shape_cast %6 : vector<1x32x8xf32> to vector<32x8xf32>
    %8 = vector.shape_cast %1 : vector<32x8xf32> to vector<32x8x1xf32>
    %9 = vector.shape_cast %5 : vector<32x8xf32> to vector<32x1x8xf32>
    %10 = vector.broadcast %8 : vector<32x8x1xf32> to vector<32x8x8xf32>
    %11 = vector.broadcast %9 : vector<32x1x8xf32> to vector<32x8x8xf32>
    %12 = arith.subf %10, %11 : vector<32x8x8xf32>
    %13 = arith.mulf %12, %12 : vector<32x8x8xf32>
    %cst = arith.constant 0.000000e+00 : f32
    %14 = vector.broadcast %cst : f32 to vector<32x8x8xf32>
    %15 = arith.subf %14, %13 : vector<32x8x8xf32>
    %16 = math.exp %15 : vector<32x8x8xf32>
    %17 = vector.shape_cast %3 : vector<32x8xf32> to vector<32x8x1xf32>
    %18 = vector.shape_cast %7 : vector<32x8xf32> to vector<32x1x8xf32>
    %19 = vector.broadcast %17 : vector<32x8x1xf32> to vector<32x8x8xf32>
    %20 = vector.broadcast %18 : vector<32x1x8xf32> to vector<32x8x8xf32>
    %21 = arith.cmpf oeq, %19, %20 : vector<32x8x8xf32>
    %cst_13 = arith.constant 0.000000e+00 : f32
    %22 = vector.broadcast %cst_13 : f32 to vector<32x8x8xf32>
    %23 = arith.select %21, %16, %22 : vector<32x8x8xi1>, vector<32x8x8xf32>
    %cst_14 = arith.constant dense<0.000000e+00> : vector<8x8xf32>
    %24 = vector.multi_reduction <add>, %23, %cst_14 [0] : vector<32x8x8xf32> to vector<8x8xf32>
    %c0_i32 = arith.constant 0 : i32
    %25 = arith.cmpi eq, %arg2, %c0_i32 : i32
    %26 = arith.extui %25 : i1 to i32
    %c0_i32_15 = arith.constant 0 : i32
    %27 = arith.cmpi ne, %26, %c0_i32_15 : i32
    scf.if %27 {
      %cst_24 = arith.constant 0.000000e+00 : f32
      %37 = vector.broadcast %cst_24 : f32 to vector<8x8xf32>
      %c0_25 = arith.constant 0 : index
      %c0_26 = arith.constant 0 : index
      %c0_27 = arith.constant 0 : index
      %38 = vector.load %arg8[%c0_25, %c0_26, %c0_27] : memref<1x8x8xf32, #tpu.memory_space<vmem>>, vector<1x8x8xf32>
      %39 = vector.shape_cast %38 : vector<1x8x8xf32> to vector<8x8xf32>
      %40 = vector.shape_cast %37 : vector<8x8xf32> to vector<1x8x8xf32>
      tpu.vector_store %arg8[%c0_25, %c0_26, %c0_27], %40 {strides = array<i32>} : memref<1x8x8xf32, #tpu.memory_space<vmem>>, vector<1x8x8xf32>,
    } else {
    }
    %c0_16 = arith.constant 0 : index
    %c0_17 = arith.constant 0 : index
    %c0_18 = arith.constant 0 : index
    %28 = vector.load %arg8[%c0_16, %c0_17, %c0_18] : memref<1x8x8xf32, #tpu.memory_space<vmem>>, vector<1x8x8xf32>
    %29 = vector.shape_cast %28 : vector<1x8x8xf32> to vector<8x8xf32>
    %30 = arith.addf %29, %24 : vector<8x8xf32>
    %c0_19 = arith.constant 0 : index
    %c0_20 = arith.constant 0 : index
    %c0_21 = arith.constant 0 : index
    %31 = vector.load %arg8[%c0_19, %c0_20, %c0_21] : memref<1x8x8xf32, #tpu.memory_space<vmem>>, vector<1x8x8xf32>
    %32 = vector.shape_cast %31 : vector<1x8x8xf32> to vector<8x8xf32>
    %33 = vector.shape_cast %30 : vector<8x8xf32> to vector<1x8x8xf32>
    tpu.vector_store %arg8[%c0_19, %c0_20, %c0_21], %33 {strides = array<i32>} : memref<1x8x8xf32, #tpu.memory_space<vmem>>, vector<1x8x8xf32>,
    %c0_i32_22 = arith.constant 0 : i32
    %34 = arith.cmpi eq, %arg2, %c0_i32_22 : i32
    %35 = arith.extui %34 : i1 to i32
    %c0_i32_23 = arith.constant 0 : i32
    %36 = arith.cmpi ne, %35, %c0_i32_23 : i32
    scf.if %36 {
      %c0_24 = arith.constant 0 : index
      %c0_25 = arith.constant 0 : index
      %c0_26 = arith.constant 0 : index
      %37 = vector.load %arg8[%c0_24, %c0_25, %c0_26] : memref<1x8x8xf32, #tpu.memory_space<vmem>>, vector<1x8x8xf32>
      %38 = vector.shape_cast %37 : vector<1x8x8xf32> to vector<8x8xf32>
      %cst_27 = arith.constant 3.125000e-02 : f32
      %39 = vector.broadcast %cst_27 : f32 to vector<8x8xf32>
      %40 = arith.mulf %38, %39 : vector<8x8xf32>
      %c0_28 = arith.constant 0 : index
      %c0_29 = arith.constant 0 : index
      %c0_30 = arith.constant 0 : index
      %41 = vector.load %arg7[%c0_28, %c0_29, %c0_30] : memref<1x8x8xi8, #tpu.memory_space<vmem>>, vector<1x8x8xi8>
      %42 = vector.shape_cast %41 : vector<1x8x8xi8> to vector<8x8xi8>
      %c0_i8 = arith.constant 0 : i8
      %43 = vector.broadcast %c0_i8 : i8 to vector<8x8xi8>
      %44 = arith.cmpi ne, %42, %43 : vector<8x8xi8>
      %cst_31 = arith.constant 0.000000e+00 : f32
      %45 = vector.broadcast %cst_31 : f32 to vector<8x8xf32>
      %46 = arith.select %44, %45, %40 : vector<8x8xi1>, vector<8x8xf32>
      %c0_32 = arith.constant 0 : index
      %c0_33 = arith.constant 0 : index
      %c0_34 = arith.constant 0 : index
      %47 = vector.load %arg8[%c0_32, %c0_33, %c0_34] : memref<1x8x8xf32, #tpu.memory_space<vmem>>, vector<1x8x8xf32>
      %48 = vector.shape_cast %47 : vector<1x8x8xf32> to vector<8x8xf32>
      %49 = vector.shape_cast %46 : vector<8x8xf32> to vector<1x8x8xf32>
      tpu.vector_store %arg8[%c0_32, %c0_33, %c0_34], %49 {strides = array<i32>} : memref<1x8x8xf32, #tpu.memory_space<vmem>>, vector<1x8x8xf32>,
    } else {
    }
    return
  }
  func.func @transform_0(%arg0: i32, %arg1: i32, %arg2: i32) -> (i32, i32, i32, i32) {
    %c0_i32 = arith.constant 0 : i32
    %c0_i32_0 = arith.constant 0 : i32
    return %arg0, %arg1, %arg2, %c0_i32 : i32, i32, i32, i32
  }
  func.func @transform_1(%arg0: i32, %arg1: i32, %arg2: i32) -> (i32, i32, i32, i32) {
    %c0_i32 = arith.constant 0 : i32
    %c0_i32_0 = arith.constant 0 : i32
    return %arg0, %arg1, %arg2, %c0_i32 : i32, i32, i32, i32
  }
  func.func @transform_2(%arg0: i32, %arg1: i32, %arg2: i32) -> (i32, i32, i32) {
    %c0_i32 = arith.constant 0 : i32
    %c0_i32_0 = arith.constant 0 : i32
    return %arg0, %arg2, %c0_i32 : i32, i32, i32
  }
  func.func @transform_3(%arg0: i32, %arg1: i32, %arg2: i32) -> (i32, i32, i32) {
    %c0_i32 = arith.constant 0 : i32
    %c0_i32_0 = arith.constant 0 : i32
    return %arg0, %arg2, %c0_i32 : i32, i32, i32
  }
  func.func @transform_4(%arg0: i32, %arg1: i32, %arg2: i32) -> (i32, i32, i32) {
    %c0_i32 = arith.constant 0 : i32
    %c0_i32_0 = arith.constant 0 : i32
    return %arg0, %arg1, %c0_i32 : i32, i32, i32
  }
  func.func @transform_5(%arg0: i32, %arg1: i32, %arg2: i32) -> (i32, i32, i32) {
    %c0_i32 = arith.constant 0 : i32
    %c0_i32_0 = arith.constant 0 : i32
    return %arg0, %arg1, %c0_i32 : i32, i32, i32
  }
}

</mosaic_0001>

<bundles_post_ra>
// kernel: tpu_custom_call.1
= control target key start
LH: loop header
LB: loop body
LE: loop exit
PB: predicated region body
PF: predicated region fallthrough
CT: control target
= control target key end

     0   :  { %10 = vsyncpa [#allocation3], 0  ;;  %s3318_s0 = inlined_call_operand.vmem [shape: f32[4,1,32,8], index: 0, kind: input, shape index: {}]   ;;  %s3319_s1 = inlined_call_operand.vmem [shape: f32[4,1,32,8], index: 1, kind: input, shape index: {}]   ;;  %s3320_s2 = inlined_call_operand.vmem [shape: f32[4,32,8], index: 2, kind: input, shape index: {}]   ;;  %s3321_s3 = inlined_call_operand.vmem [shape: f32[4,32,8], index: 3, kind: input, shape index: {}]   ;;  %s3322_s4 = inlined_call_operand.vmem [shape: s8[4,8,8], index: 4, kind: input, shape index: {}]   ;;  %s3323_s5 = inlined_call_operand.hbm [shape: f32[4,8,8], index: 5, kind: output, shape index: {}]  }
   0x1   :  { %12 = vsyncpa [#allocation3 + $0x1], 0  ;;  %s2356_s18 = smov 0   ;;  %s2358_s19 = smov 0  }
   0x2   :  { %s2360_s20 = smov 0   ;;  %s2362_s21 = smov 0  }
   0x3   :  { %s2364_s22 = smov 0   ;;  %s2366_s23 = smov 0  }
   0x4 LB: > { %s2091_s24 = sadd.s32 4294967295, %s2320_s23   ;;  %s2092_s25 = sadd.s32 4294967294, %s2320_s23   ;;  %s2320_s23 = sphi %s2366_s23, %s18_s23   ;;  %s2316_s22 = sphi %s2364_s22, %s3396_s22   ;;  %s2312_s21 = sphi %s2362_s21, %s3395_s21   ;;  %s2308_s20 = sphi %s2360_s20, %s3394_s20   ;;  %s2304_s19 = sphi %s2358_s19, %s3393_s19   ;;  %s2300_s18 = sphi %s2356_s18, %s3392_s18  }
   0x5   : > { %s37_s26 = sadd.s32 1, %s2316_s22  ;;  %s190_s27 = sadd.s32 1, %s2308_s20 }
   0x6   : > { %p39_p0 = scmp.ge.s32.totalorder %s37_s26, 4  ;;  %p200_p1 = scmp.ne.s32.totalorder %s2308_s20, %s2304_s19 }
   0x7   : > { %p201_p2 = scmp.eq.s32.totalorder %s2091_s24, 3  ;;  %p206_p3 = scmp.ne.s32.totalorder %s2304_s19, %s2300_s18 }
   0x8   : > { %s3398_s26 = smov (%p39_p0, %s37_s26), 0  ;;  %p207_p5 = scmp.eq.s32.totalorder %s2092_s25, 3 }
   0x9   : > { %p2396_p4 = por %p201_p2, %p200_p1  ;;  %s185_s29 = ssub.s32 %s2316_s22, %s3398_s26 }
   0xa   : > { %p2095_p6 = scmp.ge.s32.totalorder %s2320_s23, 1  ;;  %p188_p7 = scmp.eq.s32.totalorder %s185_s29, 0 }
   0xb   : > { %p2403_p8 = por %p207_p5, %p206_p3  ;;  %p295_p9 = scmp.lt.s32.totalorder %s2320_s23, 5 }
   0xc   : > { %s2409_s6 = scalar_select %p188_p7, %s2308_s20, %s190_s27  }
   0xd   : > { %p296_p10 = pnand %p2095_p6, %p295_p9 }
   0xf   : > { %299 = sbr.rel (%p296_p10) target bundleno = 301 (0x12d), region = 40 }
  0x14   : > { %p370_p11 = scmp.lt.s32.totalorder %s2312_s21, 3  ;;  %v442_v0 = vlaneseq  ;;  %s366_s15 = sand.u32 1, %s2304_s19   ;;  %vm1834_vm0 = vcmask 64512  }
  0x15   : > { %s2096_s16 = sshll.u32 %s366_s15, 3 }
  0x16   : > { %s2413_s7 = scalar_select %p370_p11, %s2312_s21, 3  ;;  %v2415_v1 = vshrl.u32 %v442_v0, 7 }
  0x17   : > { %s2578_s27 = scalar_lea.vmem [#allocation2], %s2096_s16 }
  0x18   : > { %s2418_s8 = sshll.u32 %s2413_s7, 5  ;;  %v2421_v2 = vsub.s32 0, %v2415_v1  ;;  %v2424_v3 = vsub.s32 2, %v2415_v1  ;;  %v2433_v4 = vsub.s32 3, %v2415_v1  ;;  %v2436_v5 = vsub.s32 1, %v2415_v1 }
  0x19   : > { %s2430_s11 = scalar_lea.vmem %s3318_s0, %s2418_s8  ;;  %v2444_v11 = vsub.s32 5, %v2415_v1  ;;  %v2447_v12 = vsub.s32 4, %v2415_v1  ;;  %v2452_v15 = vsub.s32 7, %v2415_v1  ;;  %v2455_v16 = vsub.s32 6, %v2415_v1  ;;  %s2467_s14 = scalar_lea.vmem %s3319_s1, %s2418_s8 }
  0x1a   : > { %v426_v6 = vld [vmem:[%s2430_s11] sm:$0xff]  ;;  %v2460_v19 = vld [vmem:[%s2430_s11 + $0x18] sm:$0xff]  ;;  %v427_v20 = vld [vmem:[%s2430_s11 + $0x8] sm:$0xff]  ;;  %s2576_s25 = scalar_lea.vmem %s3320_s2, %s2418_s8  ;;  %s2604_s10 = scalar_lea.vmem %s3321_s3, %s2418_s8 }
  0x1b   : > { %v459_v7 = vrot.slane %v426_v6, %v2424_v3  ;;  %v445_v8 = vrot.slane %v426_v6, %v2421_v2  ;;  %v466_v9 = vrot.slane %v426_v6, %v2433_v4  ;;  %v452_v10 = vrot.slane %v426_v6, %v2436_v5  ;;  %v2478_v25 = vld [vmem:[%s2467_s14 + $0x18] sm:$0xff]  ;;  %v430_v40 = vld [vmem:[%s2467_s14] sm:$0xff]  ;;  %v428_v51 = vld [vmem:[%s2430_s11 + $0x10] sm:$0xff]  ;;  %s2105_s8 = sshll.u32 %s2413_s7, 1  ;;  %s2107_s7 = sshll.u32 %s2312_s21, 7 }
  0x1c   : > { %v480_v13 = vrot.slane %v426_v6, %v2444_v11  ;;  %v473_v14 = vrot.slane %v426_v6, %v2447_v12  ;;  %v494_v17 = vrot.slane %v426_v6, %v2452_v15  ;;  %v487_v18 = vrot.slane %v426_v6, %v2455_v16  ;;  %v431_v56 = vld [vmem:[%s2467_s14 + $0x8] sm:$0xff]  ;;  %s423_s13 = scalar_lea.vmem %s3322_s4, %s2105_s8  ;;  %s3274_s24 = scalar_lea.hbm %s3323_s5, %s2107_s7 }
  0x1d   : > { %461 = vbcast.lane.b32.xlu1 %v459_v7, 256  ;;  %447 = vbcast.lane.b32.xlu0 %v445_v8, 256  ;;  %v620_v21 = vrot.slane %v2460_v19, %v2436_v5  ;;  %v627_v22 = vrot.slane %v2460_v19, %v2424_v3  ;;  %v634_v23 = vrot.slane %v2460_v19, %v2433_v4  ;;  %s2325_s21 = smov [#allocation2]  }
  0x1e   : > { %v641_v24 = vrot.slane %v2460_v19, %v2447_v12  ;;  %v648_v26 = vrot.slane %v2460_v19, %v2444_v11  ;;  %v655_v27 = vrot.slane %v2460_v19, %v2455_v16  ;;  %v508_v28 = vrot.slane %v427_v20, %v2436_v5  ;;  %s2248_s9 = sshll.u32 %s2325_s21, 4  ;;  %s2249_s9 = int_to_ptr.vmem [resolvable:$false] %s2248_s9 }
  0x1f   : > { %v501_v29 = vrot.slane %v427_v20, %v2421_v2  ;;  %v662_v30 = vrot.slane %v2460_v19, %v2452_v15  ;;  %v1364_v31 = vrot.slane %v2478_v25, %v2436_v5  ;;  %v1378_v32 = vrot.slane %v2478_v25, %v2433_v4 }
  0x20   : > { %v1371_v33 = vrot.slane %v2478_v25, %v2424_v3  ;;  %v1392_v34 = vrot.slane %v2478_v25, %v2444_v11  ;;  %v1385_v35 = vrot.slane %v2478_v25, %v2447_v12  ;;  %v1399_v36 = vrot.slane %v2478_v25, %v2455_v16 }
  0x21   : > { %468 = vbcast.lane.b32.xlu1 %v466_v9, 256  ;;  %454 = vbcast.lane.b32.xlu0 %v452_v10, 256  ;;  %v1406_v37 = vrot.slane %v2478_v25, %v2452_v15  ;;  %v522_v38 = vrot.slane %v427_v20, %v2433_v4  ;;  %v515_v39 = vrot.slane %v427_v20, %v2424_v3 }
  0x22   : > { %v1196_v41 = vrot.slane %v430_v40, %v2436_v5  ;;  %v1189_v42 = vrot.slane %v430_v40, %v2421_v2  ;;  %v1203_v43 = vrot.slane %v430_v40, %v2424_v3  ;;  %v529_v44 = vrot.slane %v427_v20, %v2447_v12 }
  0x23   : > { %v1210_v45 = vrot.slane %v430_v40, %v2433_v4  ;;  %v536_v46 = vrot.slane %v427_v20, %v2444_v11  ;;  %v1217_v47 = vrot.slane %v430_v40, %v2447_v12  ;;  %v543_v48 = vrot.slane %v427_v20, %v2455_v16 }
  0x24   : > { %v1224_v49 = vrot.slane %v430_v40, %v2444_v11  ;;  %v550_v50 = vrot.slane %v427_v20, %v2452_v15  ;;  %v1231_v52 = vrot.slane %v430_v40, %v2455_v16  ;;  %v557_v53 = vrot.slane %v428_v51, %v2421_v2 }
  0x25   : > { %482 = vbcast.lane.b32.xlu1 %v480_v13, 256  ;;  %475 = vbcast.lane.b32.xlu0 %v473_v14, 256  ;;  %v1238_v54 = vrot.slane %v430_v40, %v2452_v15  ;;  %v564_v55 = vrot.slane %v428_v51, %v2436_v5  ;;  %v1245_v57 = vrot.slane %v431_v56, %v2421_v2 }
  0x26   : > { %v571_v58 = vrot.slane %v428_v51, %v2424_v3  ;;  %v1252_v59 = vrot.slane %v431_v56, %v2436_v5  ;;  %v578_v60 = vrot.slane %v428_v51, %v2433_v4  ;;  %v1259_v61 = vrot.slane %v431_v56, %v2424_v3 }
  0x27   : > { %v585_v62 = vrot.slane %v428_v51, %v2447_v12  ;;  %v1266_v63 = vrot.slane %v431_v56, %v2433_v4  ;;  %v592_v0 = vrot.slane %v428_v51, %v2444_v11  ;;  %v1273_v6 = vrot.slane %v431_v56, %v2447_v12 }
  0x28   : > { %v599_v7 = vrot.slane %v428_v51, %v2455_v16  ;;  %v1280_v8 = vrot.slane %v431_v56, %v2444_v11  ;;  %v606_v9 = vrot.slane %v428_v51, %v2452_v15  ;;  %v1287_v10 = vrot.slane %v431_v56, %v2455_v16 }
  0x29   : > { %496 = vbcast.lane.b32.xlu1 %v494_v17, 256  ;;  %489 = vbcast.lane.b32.xlu0 %v487_v18, 256  ;;  %v613_v13 = vrot.slane %v2460_v19, %v2421_v2  ;;  %v1294_v14 = vrot.slane %v431_v56, %v2452_v15  ;;  %v432_v17 = vld [vmem:[%s2467_s14 + $0x10] sm:$0xff]  ;;  %v1357_v40 = vrot.slane %v2478_v25, %v2421_v2  ;;  %v2323_v19 = vmov 0.0   ;;  %s1933_s14 = sshll.u32 %s2578_s27, 4  ;;  %s1934_s14 = int_to_ptr.vmem [resolvable:$true] %s1933_s14 }
  0x2a   : > { %v1301_v18 = vrot.slane %v432_v17, %v2421_v2  ;;  %v1308_v20 = vrot.slane %v432_v17, %v2436_v5  ;;  %1902 = vst.msk [vmem:[%s2578_s27] sm:$0xff] %vm1834_vm0, %v2323_v19  ;;  %s2244_s29 = scalar_lea.vmem %s1934_s14, 128  ;;  %p2251_p1 = scmp.lt.s32.totalorder %s1934_s14, %s2249_s9 }
  0x2b   : > { %p2245_p12 = scmp.ne.s32.totalorder %s1934_s14, %s2244_s29 }
  0x2d   : > { %510 = vbcast.lane.b32.xlu1 %v508_v28, 256  ;;  %503 = vbcast.lane.b32.xlu0 %v501_v29, 256  ;;  %v1315_v28 = vrot.slane %v432_v17, %v2424_v3  ;;  %p2246_p13 = pnand %p2245_p12, %p2396_p4 }
  0x2f   : > { %p2247_p0 = pneg %p2246_p13 }
  0x31   : > { %524 = vbcast.lane.b32.xlu1 %v522_v38, 256  ;;  %517 = vbcast.lane.b32.xlu0 %v515_v39, 256  ;;  %v1343_v38 = vrot.slane %v432_v17, %v2455_v16 }
  0x35   : > { %1198 = vbcast.lane.b32.xlu1 %v1196_v41, 256  ;;  %1191 = vbcast.lane.b32.xlu0 %v1189_v42, 256 }
  0x39   : > { %1205 = vbcast.lane.b32.xlu1 %v1203_v43, 256  ;;  %531 = vbcast.lane.b32.xlu0 %v529_v44, 256 }
  0x3d   : > { %1212 = vbcast.lane.b32.xlu1 %v1210_v45, 256  ;;  %538 = vbcast.lane.b32.xlu0 %v536_v46, 256 }
  0x41   : > { %1219 = vbcast.lane.b32.xlu1 %v1217_v47, 256  ;;  %545 = vbcast.lane.b32.xlu0 %v543_v48, 256 }
  0x45   : > { %1226 = vbcast.lane.b32.xlu1 %v1224_v49, 256  ;;  %552 = vbcast.lane.b32.xlu0 %v550_v50, 256 }
  0x49   : > { %1233 = vbcast.lane.b32.xlu1 %v1231_v52, 256  ;;  %559 = vbcast.lane.b32.xlu0 %v557_v53, 256 }
  0x4d   : > { %1240 = vbcast.lane.b32.xlu1 %v1238_v54, 256  ;;  %566 = vbcast.lane.b32.xlu0 %v564_v55, 256 }
  0x51   : > { %1247 = vbcast.lane.b32.xlu1 %v1245_v57, 256  ;;  %573 = vbcast.lane.b32.xlu0 %v571_v58, 256 }
  0x55   : > { %1254 = vbcast.lane.b32.xlu1 %v1252_v59, 256  ;;  %580 = vbcast.lane.b32.xlu0 %v578_v60, 256 }
  0x59   : > { %1261 = vbcast.lane.b32.xlu1 %v1259_v61, 256  ;;  %587 = vbcast.lane.b32.xlu0 %v585_v62, 256  ;;  %v436_v62 = vld [vmem:[%s2576_s25 + $0x10] sm:$0xff] }
  0x5d   : > { %1268 = vbcast.lane.b32.xlu1 %v1266_v63, 256  ;;  %594 = vbcast.lane.b32.xlu0 %v592_v0, 256 }
  0x61   : > { %1275 = vbcast.lane.b32.xlu1 %v1273_v6, 256  ;;  %601 = vbcast.lane.b32.xlu0 %v599_v7, 256 }
  0x65   : > { %1282 = vbcast.lane.b32.xlu1 %v1280_v8, 256  ;;  %608 = vbcast.lane.b32.xlu0 %v606_v9, 256 }
  0x69   : > { %1289 = vbcast.lane.b32.xlu1 %v1287_v10, 256  ;;  %615 = vbcast.lane.b32.xlu0 %v613_v13, 256 }
  0x6d   : > { %1296 = vbcast.lane.b32.xlu1 %v1294_v14, 256  ;;  %622 = vbcast.lane.b32.xlu0 %v620_v21, 256  ;;  %v1322_v21 = vrot.slane %v432_v17, %v2433_v4  ;;  %v438_v4 = vld [vmem:[%s2604_s10] sm:$0xff] }
  0x6e   : > { %v1414_v57 = vcombine.high %v438_v4, %v438_v4 }
  0x71   : > { %1303 = vbcast.lane.b32.xlu1 %v1301_v18, 256  ;;  %629 = vbcast.lane.b32.xlu0 %v627_v22, 256  ;;  %v1329_v22 = vrot.slane %v432_v17, %v2447_v12 }
  0x75   : > { %1310 = vbcast.lane.b32.xlu1 %v1308_v20, 256  ;;  %636 = vbcast.lane.b32.xlu0 %v634_v23, 256  ;;  %v1336_v23 = vrot.slane %v432_v17, %v2444_v11 }
  0x79   : > { %1317 = vbcast.lane.b32.xlu1 %v1315_v28, 256  ;;  %643 = vbcast.lane.b32.xlu0 %v641_v24, 256  ;;  %v2322_v24 = vmov 1966171168  }
  0x7a   : > { %v672_v29 = vunpack.c.l.s4 %v2322_v24 }
  0x7c   : > { %v673_v39 = vunpack.c.0.s8 %v672_v29 }
  0x7d   : > { %1324 = vbcast.lane.b32.xlu1 %v1322_v21, 256  ;;  %650 = vbcast.lane.b32.xlu0 %v648_v26, 256  ;;  %v1350_v26 = vrot.slane %v432_v17, %v2452_v15 }
  0x81   : > { %1331 = vbcast.lane.b32.xlu1 %v1329_v22, 256  ;;  %657 = vbcast.lane.b32.xlu0 %v655_v27, 256  ;;  %v2583_v27 = vsub.s32 %v673_v39, %v2415_v1  ;;  %v435_v1 = vld [vmem:[%s2576_s25 + $0x8] sm:$0xff] }
  0x83   : > { %v726_v3 = vrot.slane %v435_v1, %v2583_v27  ;;  %v1421_v48 = vrot.slane %v438_v4, %v2583_v27  ;;  %v1428_v28 = vrot.slane %v1414_v57, %v2583_v27  ;;  %v775_v21 = vrot.slane %v436_v62, %v2583_v27 }
  0x85   : > { %1338 = vbcast.lane.b32.xlu1 %v1336_v23, 256  ;;  %664 = vbcast.lane.b32.xlu0 %v662_v30, 256  ;;  %v434_v30 = vld [vmem:[%s2576_s25] sm:$0xff]  ;;  %v734_v12 = vcombine.high %v726_v3, %v726_v3  ;;  %v1429_v54 = vcombine.high %v1421_v48, %v1421_v48  ;;  %v2684_v8 = vrot.slane %v1421_v48, %v2583_v27 }
  0x86   : > { %v670_v43 = vcombine.high %v434_v30, %v434_v30  ;;  %v677_v44 = vrot.slane %v434_v30, %v2583_v27  ;;  %v2737_v48 = vrot.slane %v775_v21, %v2583_v27 }
  0x87   : > { %v2662_v55 = vrot.slane %v734_v12, %v2583_v27  ;;  %v2681_v7 = vrot.slane %v1429_v54, %v2583_v27  ;;  %v1459_v18 = vcombine.high %v2684_v8, %v2684_v8 }
  0x88   : > { %v685_v45 = vcombine.high %v677_v44, %v677_v44  ;;  %v684_v46 = vrot.slane %v670_v43, %v2583_v27  ;;  %v1430_v43 = vcombine.high %v1428_v28, %v1428_v28 }
  0x89   : > { %1352 = vbcast.lane.b32.xlu1 %v1350_v26, 256  ;;  %1345 = vbcast.lane.b32.xlu0 %v1343_v38, 256  ;;  %v766_v6 = vcombine.high %v2662_v55, %v2662_v55  ;;  %v1461_v20 = vcombine.high %v2681_v7, %v2681_v7  ;;  %v439_v26 = vld [vmem:[%s2604_s10 + $0x8] sm:$0xff]  ;;  %v2731_v4 = vrot.slane %v1459_v18, %v2421_v2 }
  0x8a   : > { %v2629_v49 = vrot.slane %v685_v45, %v2583_v27  ;;  %v686_v50 = vcombine.high %v684_v46, %v684_v46  ;;  %v783_v45 = vcombine.high %v775_v21, %v775_v21  ;;  %v2755_v57 = vrot.slane %v1430_v43, %v2583_v27 }
  0x8b   : > { %v2715_v38 = vrot.slane %v766_v6, %v2421_v2 }
  0x8c   : > { %v717_v16 = vcombine.high %v2629_v49, %v2629_v49  ;;  %v2651_v15 = vrot.slane %v686_v50, %v2583_v27  ;;  %v873_v58 = vrot.slane %v2629_v49, %v2421_v2  ;;  %v1470_v49 = vrot.slane %v439_v26, %v2583_v27 }
  0x8d   : > { %1366 = vbcast.lane.b32.xlu1 %v1364_v31, 256  ;;  %1359 = vbcast.lane.b32.xlu0 %v1357_v40, 256  ;;  %v2763_v6 = vrot.slane %v783_v45, %v2583_v27  ;;  %v1462_v18 = vcombine.high %v2755_v57, %v2755_v57  ;;  %v813_v45 = vcombine.high %v2737_v48, %v2737_v48 }
  0x8e   : > { %v718_v60 = vcombine.high %v2651_v15, %v2651_v15  ;;  %v2687_v10 = vrot.slane %v717_v16, %v2421_v2  ;;  %v889_v13 = vrot.slane %v2651_v15, %v2421_v2 }
  0x8f   : > { %v2589_v41 = vpop.permute.xlu1 %461  ;;  %v2591_v42 = vpop.permute.xlu0 %447 }
  0x90   : > { %v2703_v22 = vrot.slane %v718_v60, %v2421_v2  ;;  %v1478_v60 = vcombine.high %v1470_v49, %v1470_v49 }
  0x91   : > { %1380 = vbcast.lane.b32.xlu1 %v1378_v32, 256  ;;  %1373 = vbcast.lane.b32.xlu0 %v1371_v33, 256  ;;  %v2614_v32 = vrot.slane %v677_v44, %v2583_v27  ;;  %v2828_v44 = vrot.slane %v813_v45, %v2421_v2 }
  0x93   : > { %v2607_v5 = vpop.permute.xlu1 %468  ;;  %v2609_v31 = vpop.permute.xlu0 %454  ;;  %v715_v11 = vcombine.high %v2614_v32, %v2614_v32  ;;  %v869_v51 = vrot.slane %v2614_v32, %v2421_v2 }
  0x94   : > { %v1027_v54 = vsub.f32 %v2609_v31, %v873_v58 }
  0x95   : > { %1394 = vbcast.lane.b32.xlu1 %v1392_v34, 256  ;;  %1387 = vbcast.lane.b32.xlu0 %v1385_v35, 256  ;;  %v719_v34 = vcombine.high %v435_v1, %v435_v1  ;;  %v2640_v35 = vrot.slane %v684_v46, %v2583_v27  ;;  %v768_v46 = vcombine.high %v436_v62, %v436_v62 }
  0x96   : > { %v1026_v58 = vsub.f32 %v2591_v42, %v869_v51  ;;  %v1059_v43 = vmul.f32 %v1027_v54, %v1027_v54 }
  0x97   : > { %v2623_v33 = vpop.permute.xlu1 %482  ;;  %v2625_v47 = vpop.permute.xlu0 %475  ;;  %v716_v25 = vcombine.high %v2640_v35, %v2640_v35  ;;  %v733_v56 = vrot.slane %v719_v34, %v2583_v27  ;;  %v885_v59 = vrot.slane %v2640_v35, %v2421_v2  ;;  %v1463_v34 = vcombine.high %v439_v26, %v439_v26 }
  0x98   : > { %v782_v31 = vrot.slane %v768_v46, %v2583_v27  ;;  %v2792_v46 = vrot.slane %v1478_v60, %v2583_v27 }
  0x99   : > { %1401 = vbcast.lane.b32.xlu0 %v1399_v36, 256  ;;  %1408 = vbcast.lane.b32.xlu1 %v1406_v37, 256  ;;  %v2656_v36 = vrot.slane %v726_v3, %v2583_v27  ;;  %v2659_v37 = vrot.slane %v715_v11, %v2421_v2  ;;  %v735_v9 = vcombine.high %v733_v56, %v733_v56 }
  0x9a   : > { %v2692_v14 = vrot.slane %v716_v25, %v2421_v2  ;;  %v2711_v29 = vrot.slane %v733_v56, %v2583_v27  ;;  %v2734_v3 = vrot.slane %v1461_v20, %v2421_v2  ;;  %v2743_v11 = vrot.slane %v1428_v28, %v2583_v27  ;;  %3332 = vst [vmem:[#allocation5_spill] sm:$0xff] %v2792_v46 }
  0x9b   : > { %v2644_v52 = vpop.permute.xlu1 %496  ;;  %v2646_v53 = vpop.permute.xlu0 %489  ;;  %v764_v61 = vcombine.high %v2656_v36, %v2656_v36  ;;  %v2724_v30 = vrot.slane %v735_v9, %v2583_v27  ;;  %v2775_v20 = vrot.slane %v1470_v49, %v2583_v27  ;;  %v784_v26 = vcombine.high %v782_v31, %v782_v31 }
  0x9c   : > { %v765_v1 = vcombine.high %v2711_v29, %v2711_v29  ;;  %v1460_v62 = vcombine.high %v2743_v11, %v2743_v11  ;;  %v1477_v32 = vrot.slane %v1463_v34, %v2583_v27  ;;  %v815_v34 = vcombine.high %v2763_v6, %v2763_v6 }
  0x9d   : > { %v2708_v24 = vrot.slane %v764_v61, %v2421_v2  ;;  %v767_v12 = vcombine.high %v2724_v30, %v2724_v30  ;;  %v1028_v9 = vsub.f32 %v2589_v41, %v2659_v37  ;;  %v2804_v28 = vrot.slane %v1462_v18, %v2421_v2  ;;  %v2819_v41 = vld [vmem:[%s2576_s25 + $0x18] sm:$0xff]  ;;  %s1919_s25 = scalar_lea.sflag [#allocation3], %s366_s15 }
  0x9e   : > { %v2758_v61 = vrot.slane %v765_v1, %v2421_v2  ;;  %v2795_v49 = vrot.slane %v1460_v62, %v2421_v2  ;;  %v1479_v54 = vcombine.high %v1477_v32, %v1477_v32  ;;  %v1058_v1 = vmul.f32 %v1026_v58, %v1026_v58 }
  0x9f   : > { %v2674_v63 = vpop.permute.xlu1 %510  ;;  %v2676_v0 = vpop.permute.xlu0 %503  ;;  %v2780_v21 = vrot.slane %v767_v12, %v2421_v2  ;;  %v1508_v62 = vcombine.high %v2775_v20, %v2775_v20  ;;  %v2811_v56 = vrot.slane %v782_v31, %v2583_v27  ;;  %v1510_v12 = vcombine.high %v2792_v46, %v2792_v46 }
  0xa0   : > { %v2816_v50 = vrot.slane %v784_v26, %v2583_v27  ;;  %v1029_v37 = vsub.f32 %v2607_v5, %v2687_v10  ;;  %v1091_v58 = vsub.f32 0.0, %v1059_v43  ;;  %v2833_v19 = vrot.slane %v815_v34, %v2421_v2 }
  0xa1   : > { %v2836_v26 = vrot.slane %v1477_v32, %v2583_v27  ;;  %v814_v5 = vcombine.high %v2811_v56, %v2811_v56  ;;  %v2841_v10 = vrot.slane %v1479_v54, %v2583_v27  ;;  %v1060_v43 = vmul.f32 %v1028_v9, %v1028_v9 }
  0xa2   : > { %3333 = vst [vmem:[#allocation6_spill] sm:$0xff] %v2816_v50  ;;  %v1090_v23 = vsub.f32 0.0, %v1058_v1  ;;  %v1030_v45 = vsub.f32 %v2625_v47, %v885_v59  ;;  %v824_v34 = vrot.slane %v2819_v41, %v2583_v27  ;;  %v2850_v32 = vrot.slane %v1508_v62, %v2421_v2 }
  0xa3   : > { %v2717_v39 = vpop.permute.xlu1 %524  ;;  %v2719_v40 = vpop.permute.xlu0 %517  ;;  %3334 = vst [vmem:[#allocation7_spill] sm:$0xff] %v2836_v26  ;;  %3335 = vst [vmem:[#allocation8_spill] sm:$0xff] %v2841_v10  ;;  %v2855_v17 = vrot.slane %v1510_v12, %v2421_v2  ;;  %v1061_v1 = vmul.f32 %v1029_v37, %v1029_v37  ;;  %v1124_v54 = vmul.f32 1.442695, %v1091_v58  ;;  %v1031_v47 = vsub.f32 %v2623_v33, %v889_v13 }
  0xa4   : > { %3336 = vst [vmem:[#allocation9_spill] sm:$0xff] %v2850_v32  ;;  %v832_v62 = vcombine.high %v824_v34, %v824_v34  ;;  %v2868_v32 = vld [vmem:[%s2604_s10 + $0x10] sm:$0xff]  ;;  %v2873_v31 = vrot.slane %v814_v5, %v2421_v2  ;;  %v816_v15 = vcombine.high %v2816_v50, %v2816_v50  ;;  %v1092_v33 = vsub.f32 0.0, %v1060_v43 }
  0xa5   : > { %3337 = vst [vmem:[#allocation10_spill] sm:$0xff] %v2855_v17  ;;  %v1122_v13 = vmul.f32 1.442695, %v1090_v23  ;;  %v1062_v58 = vmul.f32 %v1030_v45, %v1030_v45  ;;  %v1509_v9 = vcombine.high %v2836_v26, %v2836_v26  ;;  %v1032_v17 = vsub.f32 %v2646_v53, %v2692_v14 }
  0xa6   : > { %3338 = vst [vmem:[#allocation11_spill] sm:$0xff] %v2873_v31  ;;  %v2884_v12 = vrot.slane %v824_v34, %v2583_v27  ;;  %v1511_v5 = vcombine.high %v2841_v10, %v2841_v10  ;;  %v1519_v37 = vrot.slane %v2868_v32, %v2583_v27  ;;  %v1093_v31 = vsub.f32 0.0, %v1061_v1 }
  0xa7   : > { %v2748_v16 = vpop.permute.xlu1 %1198  ;;  %v2750_v25 = vpop.permute.xlu0 %1191  ;;  %2180 = vpow2.f32 %v1124_v54  ;;  %v1063_v43 = vmul.f32 %v1031_v47, %v1031_v47  ;;  %v2895_v26 = vrot.slane %v832_v62, %v2583_v27  ;;  %v1033_v53 = vsub.f32 %v2644_v52, %v2703_v22 }
  0xa8   : > { %v2900_v14 = vrot.slane %v816_v15, %v2421_v2  ;;  %v1527_v34 = vcombine.high %v1519_v37, %v1519_v37  ;;  %v817_v10 = vcombine.high %v2819_v41, %v2819_v41  ;;  %v1126_v1 = vmul.f32 1.442695, %v1092_v33 }
  0xa9   : > { %2182 = vpow2.f32 %v1122_v13  ;;  %v1094_v54 = vsub.f32 0.0, %v1062_v58  ;;  %v3339_v47 = vrot.slane %v2656_v36, %v2421_v2  ;;  %v1064_v62 = vmul.f32 %v1032_v17, %v1032_v17 }
  0xaa   : > { %v2909_v46 = vrot.slane %v1509_v9, %v2421_v2  ;;  %v2914_v22 = vrot.slane %v1519_v37, %v2583_v27  ;;  %v1128_v15 = vmul.f32 1.442695, %v1093_v31  ;;  %v1095_v41 = vsub.f32 0.0, %v1063_v43 }
  0xab   : > { %v2783_v42 = vpop.permute.xlu1 %1205  ;;  %v2785_v51 = vpop.permute.xlu0 %531  ;;  %v1034_v50 = vsub.f32 %v2676_v0, %v3339_v47  ;;  %v2921_v36 = vrot.slane %v1511_v5, %v2421_v2  ;;  %v1065_v17 = vmul.f32 %v1033_v53, %v1033_v53  ;;  %v862_v9 = vcombine.high %v2884_v12, %v2884_v12 }
  0xac   : > { %3340 = vst [vmem:[#allocation12_spill] sm:$0xff] %v2914_v22  ;;  %v2928_v58 = vrot.slane %v1527_v34, %v2583_v27  ;;  %v831_v31 = vrot.slane %v817_v10, %v2583_v27  ;;  %2184 = vpow2.f32 %v1126_v1  ;;  %v1130_v37 = vmul.f32 1.442695, %v1094_v54 }
  0xad   : > { %3341 = vst [vmem:[#allocation13_spill] sm:$0xff] %v2921_v36  ;;  %v3342_v43 = vrot.slane %v2662_v55, %v2421_v2  ;;  %v1066_v47 = vmul.f32 %v1034_v50, %v1034_v50  ;;  %v1096_v52 = vsub.f32 0.0, %v1064_v62  ;;  %v864_v0 = vcombine.high %v2895_v26, %v2895_v26 }
  0xae   : > { %v1557_v34 = vcombine.high %v2914_v22, %v2914_v22  ;;  %2186 = vpow2.f32 %v1128_v15  ;;  %v1132_v10 = vmul.f32 1.442695, %v1095_v41  ;;  %v1036_v1 = vsub.f32 %v2719_v40, %v2708_v24 }
  0xaf   : > { %v2823_v18 = vpop.permute.xlu1 %1212  ;;  %v2825_v60 = vpop.permute.xlu0 %538  ;;  %v1035_v5 = vsub.f32 %v2674_v63, %v3342_v43  ;;  %v1512_v63 = vcombine.high %v2868_v32, %v2868_v32  ;;  %v1097_v50 = vsub.f32 0.0, %v1065_v17  ;;  %v2950_v62 = vrot.slane %v862_v9, %v2421_v2 }
  0xb0   : > { %v2955_v15 = vrot.slane %v831_v31, %v2583_v27  ;;  %2188 = vpow2.f32 %v1130_v37  ;;  %v1098_v24 = vsub.f32 0.0, %v1066_v47  ;;  %v1037_v40 = vsub.f32 %v2717_v39, %v2715_v38 }
  0xb1   : > { %v1067_v41 = vmul.f32 %v1035_v5, %v1035_v5  ;;  %v1134_v53 = vmul.f32 1.442695, %v1096_v52  ;;  %v2960_v22 = vrot.slane %v864_v0, %v2421_v2  ;;  %v1559_v32 = vcombine.high %v2928_v58, %v2928_v58 }
  0xb2   : > { %v833_v17 = vcombine.high %v831_v31, %v831_v31  ;;  %2190 = vpow2.f32 %v1132_v10  ;;  %v1068_v9 = vmul.f32 %v1036_v1, %v1036_v1  ;;  %v2969_v37 = vrot.slane %v1557_v34, %v2421_v2 }
  0xb3   : > { %v2863_v35 = vpop.permute.xlu1 %1219  ;;  %v2865_v59 = vpop.permute.xlu0 %545  ;;  %v2972_v5 = vrot.slane %v1512_v63, %v2583_v27  ;;  %v1136_v39 = vmul.f32 1.442695, %v1097_v50  ;;  %v3343_v52 = vrot.slane %v2681_v7, %v2421_v2  ;;  %v3346_v31 = vrot.slane %v2684_v8, %v2421_v2 }
  0xb4   : > { %v2181_v38 = vpop.eup %2180  ;;  %v3349_v34 = vrot.slane %v2711_v29, %v2421_v2  ;;  %v1099_v1 = vsub.f32 0.0, %v1067_v41  ;;  %v1138_v7 = vmul.f32 1.442695, %v1098_v24  ;;  %v1069_v63 = vmul.f32 %v1037_v40, %v1037_v40 }
  0xb5   : > { %vm2978_vm1 = vcmp.eq.f32.partialorder %v2748_v16, %v3343_v52  ;;  %vm2986_vm2 = vcmp.eq.f32.partialorder %v2750_v25, %v3346_v31  ;;  %v981_v16 = vrot.slane %v2955_v15, %v2421_v2  ;;  %2192 = vpow2.f32 %v1134_v53 }
  0xb6   : > { %v1038_v10 = vsub.f32 %v2785_v51, %v3349_v34  ;;  %v2183_v50 = vpop.eup %2182  ;;  %v3350_v8 = vrot.slane %v2724_v30, %v2421_v2  ;;  %v3001_v52 = vrot.slane %v1559_v32, %v2421_v2  ;;  %v3004_v29 = vrot.slane %v833_v17, %v2583_v27 }
  0xb7   : > { %v2890_v23 = vpop.permute.xlu1 %1226  ;;  %v2892_v45 = vpop.permute.xlu0 %552  ;;  %v1100_v51 = vsub.f32 0.0, %v1068_v9  ;;  %v1803_v41 = vsel %vm2978_vm1, %v2181_v38, 0.0  ;;  %v1802_v24 = vsel %vm2986_vm2, %v2183_v50, 0.0  ;;  %v3016_v30 = vrot.slane %v2972_v5, %v2583_v27 }
  0xb8   : > { %v1039_v25 = vsub.f32 %v2825_v60, %v3350_v8  ;;  %2194 = vpow2.f32 %v1136_v39  ;;  %vm1772_vm3 = vcmp.eq.f32.partialorder %v2783_v42, %v2731_v4  ;;  %v1070_v60 = vmul.f32 %v1038_v10, %v1038_v10 }
  0xb9   : > { %v863_v32 = vcombine.high %v2955_v15, %v2955_v15  ;;  %v1140_v17 = vmul.f32 1.442695, %v1099_v1  ;;  %2196 = vpow2.f32 %v1138_v7  ;;  %v1101_v9 = vsub.f32 0.0, %v1069_v63  ;;  %v2185_v0 = vpop.eup %2184 }
  0xba   : > { %v1040_v38 = vsub.f32 %v2865_v59, %v2758_v61  ;;  %v1836_v31 = vsel %vm1834_vm0, %v1803_v41, 0.0  ;;  %v1835_v47 = vsel %vm1834_vm0, %v1802_v24, 0.0  ;;  %vm1773_vm4 = vcmp.eq.f32.partialorder %v2823_v18, %v2734_v3 }
  0xbb   : > { %v2916_v33 = vpop.permute.xlu1 %1233  ;;  %v2918_v13 = vpop.permute.xlu0 %559  ;;  %v1071_v39 = vmul.f32 %v1039_v25, %v1039_v25  ;;  %v1142_v4 = vmul.f32 1.442695, %v1100_v51  ;;  %v1804_v42 = vsel %vm1772_vm3, %v2185_v0, 0.0  ;;  %v1041_v34 = vsub.f32 %v2892_v45, %v2780_v21 }
  0xbc   : > { %v985_v61 = vrot.slane %v3004_v29, %v2421_v2  ;;  %v2187_v59 = vpop.eup %2186  ;;  %v1102_v7 = vsub.f32 0.0, %v1070_v60  ;;  %v3351_v63 = vrot.slane %v2743_v11, %v2421_v2  ;;  %v1693_v18 = vrot.slane %v3016_v30, %v2421_v2 }
  0xbd   : > { %v3045_v21 = vrot.slane %v863_v32, %v2421_v2  ;;  %v1144_v45 = vmul.f32 1.442695, %v1101_v9  ;;  %v1837_v50 = vadd.f32 %v1836_v31, %v1835_v47  ;;  %v1805_v8 = vsel %vm1773_vm4, %v2187_v59, 0.0  ;;  %v2189_v51 = vpop.eup %2188 }
  0xbe   : > { %vm3038_vm5 = vcmp.eq.f32.partialorder %v2863_v35, %v3351_v63  ;;  %v1072_v25 = vmul.f32 %v1040_v38, %v1040_v38  ;;  %2198 = vpow2.f32 %v1140_v17  ;;  %v1838_v41 = vsel %vm1834_vm0, %v1804_v42, 0.0 }
  0xbf   : > { %v2943_v54 = vpop.permute.xlu1 %1240  ;;  %v2945_v55 = vpop.permute.xlu0 %566  ;;  %v1103_v11 = vsub.f32 0.0, %v1071_v39  ;;  %v3354_v35 = vrot.slane %v2737_v48, %v2421_v2  ;;  %2200 = vpow2.f32 %v1142_v4  ;;  %v1806_v60 = vsel %vm3038_vm5, %v2189_v51, 0.0 }
  0xc0   : > { %v3355_v32 = vrot.slane %v2755_v57, %v2421_v2  ;;  %v1073_v17 = vmul.f32 %v1041_v34, %v1041_v34  ;;  %v2191_v31 = vpop.eup %2190  ;;  %v1146_v48 = vmul.f32 1.442695, %v1102_v7  ;;  %v3358_v47 = vrot.slane %v2763_v6, %v2421_v2 }
  0xc1   : > { %v1042_v24 = vsub.f32 %v2918_v13, %v3354_v35  ;;  %v1840_v13 = vsel %vm1834_vm0, %v1805_v8, 0.0  ;;  %v1528_v57 = vcombine.high %v2972_v5, %v2972_v5  ;;  %2202 = vpow2.f32 %v1144_v45 }
  0xc2   : > { %vm3058_vm6 = vcmp.eq.f32.partialorder %v2890_v23, %v3355_v32  ;;  %v1043_v39 = vsub.f32 %v2945_v55, %v3358_v47  ;;  %v1839_v23 = vadd.f32 %v1838_v41, %v1837_v50  ;;  %v1104_v4 = vsub.f32 0.0, %v1072_v25  ;;  %v2193_v63 = vpop.eup %2192 }
  0xc3   : > { %v2964_v43 = vpop.permute.xlu1 %1247  ;;  %v2966_v36 = vpop.permute.xlu0 %573  ;;  %vm1776_vm7 = vcmp.eq.f32.partialorder %v2916_v33, %v2795_v49  ;;  %v1148_v42 = vmul.f32 1.442695, %v1103_v11  ;;  %v1842_v34 = vsel %vm1834_vm0, %v1806_v60, 0.0  ;;  %v1807_v59 = vsel %vm3058_vm6, %v2191_v31, 0.0 }
  0xc4   : > { %v1074_v7 = vmul.f32 %v1042_v24, %v1042_v24  ;;  %v1841_v6 = vadd.f32 %v1840_v13, %v1839_v23  ;;  %v1105_v3 = vsub.f32 0.0, %v1073_v17  ;;  %vm1777_vm8 = vcmp.eq.f32.partialorder %v2943_v54, %v2804_v28 }
  0xc5   : > { %v1044_v55 = vsub.f32 %v2966_v36, %v2828_v44  ;;  %2204 = vpow2.f32 %v1146_v48  ;;  %v1808_v49 = vsel %vm1776_vm7, %v2193_v63, 0.0  ;;  %v1075_v33 = vmul.f32 %v1043_v39, %v1043_v39  ;;  %v2195_v8 = vpop.eup %2194  ;;  %v3367_v39 = vld [vmem:[#allocation6_spill] sm:$0xff] }
  0xc6   : > { %v1843_v25 = vadd.f32 %v1842_v34, %v1841_v6  ;;  %v1150_v51 = vmul.f32 1.442695, %v1104_v4  ;;  %v1844_v41 = vsel %vm1834_vm0, %v1807_v59, 0.0  ;;  %v3359_v11 = vrot.slane %v2775_v20, %v2421_v2  ;;  %v2197_v44 = vpop.eup %2196  ;;  %v3369_v34 = vld [vmem:[#allocation9_spill] sm:$0xff] }
  0xc7   : > { %v3010_v40 = vpop.permute.xlu1 %1254  ;;  %v3012_v53 = vpop.permute.xlu0 %580  ;;  %2206 = vpow2.f32 %v1148_v42  ;;  %v1106_v36 = vsub.f32 0.0, %v1074_v7  ;;  %v1152_v60 = vmul.f32 1.442695, %v1105_v3  ;;  %v1846_v32 = vsel %vm1834_vm0, %v1808_v49, 0.0 }
  0xc8   : > { %v1045_v50 = vsub.f32 %v3012_v53, %v2833_v19  ;;  %vm3087_vm9 = vcmp.eq.f32.partialorder %v2964_v43, %v3359_v11  ;;  %v1809_v19 = vsel %vm1777_vm8, %v2195_v8, 0.0  ;;  %v3362_v53 = vrot.slane %v2811_v56, %v2421_v2  ;;  %v3363_v56 = vld [vmem:[#allocation5_spill] sm:$0xff] }
  0xc9   : > { %v1076_v20 = vmul.f32 %v1044_v55, %v1044_v55  ;;  %v3099_v17 = vrot.slane %v1528_v57, %v2583_v27  ;;  %v1845_v31 = vadd.f32 %v1844_v41, %v1843_v25  ;;  %v1107_v48 = vsub.f32 0.0, %v1075_v33  ;;  %v3371_v41 = vld [vmem:[#allocation11_spill] sm:$0xff] }
  0xca   : > { %v1810_v13 = vsel %vm3087_vm9, %v2197_v44, 0.0  ;;  %v1077_v28 = vmul.f32 %v1045_v50, %v1045_v50  ;;  %2208 = vpow2.f32 %v1150_v51  ;;  %v1848_v54 = vsel %vm1834_vm0, %v1809_v19, 0.0 }
  0xcb   : > { %v3030_v10 = vpop.permute.xlu1 %1261  ;;  %v588_v1 = vpop.permute.xlu0 %587  ;;  %v3368_v57 = vrot.slane %v3367_v39, %v2421_v2  ;;  %v1847_v4 = vadd.f32 %v1846_v32, %v1845_v31  ;;  %v1154_v42 = vmul.f32 1.442695, %v1106_v36  ;;  %2210 = vpow2.f32 %v1152_v60  ;;  %v3372_v60 = vld [vmem:[#allocation7_spill] sm:$0xff]  ;;  %v3376_v39 = vld [vmem:[#allocation8_spill] sm:$0xff] }
  0xcc   : > { %v1046_v24 = vsub.f32 %v588_v1, %v3362_v53  ;;  %v3364_v1 = vrot.slane %v3363_v56, %v2421_v2  ;;  %vm1780_vm11 = vcmp.eq.f32.partialorder %v3030_v10, %v3369_v34  ;;  %v2199_v7 = vpop.eup %2198  ;;  %v1850_v63 = vsel %vm1834_vm0, %v1810_v13, 0.0  ;;  %v3370_v10 = vld [vmem:[#allocation10_spill] sm:$0xff] }
  0xcd   : > { %v1108_v6 = vsub.f32 0.0, %v1076_v20  ;;  %v865_v55 = vcombine.high %v3004_v29, %v3004_v29  ;;  %v2201_v49 = vpop.eup %2200  ;;  %v1849_v33 = vadd.f32 %v1848_v54, %v1847_v4  ;;  %v1156_v50 = vmul.f32 1.442695, %v1107_v48 }
  0xce   : > { %vm3108_vm10 = vcmp.eq.f32.partialorder %v3010_v40, %v3364_v1  ;;  %v1078_v59 = vmul.f32 %v1046_v24, %v1046_v24  ;;  %v1109_v8 = vsub.f32 0.0, %v1077_v28  ;;  %v1812_v25 = vsel %vm1780_vm11, %v2201_v49, 0.0  ;;  %v2203_v35 = vpop.eup %2202 }
  0xcf   : > { %v3062_v38 = vpop.permute.xlu1 %1268  ;;  %v595_v0 = vpop.permute.xlu0 %594  ;;  %2212 = vpow2.f32 %v1154_v42  ;;  %v1851_v44 = vadd.f32 %v1850_v63, %v1849_v33  ;;  %v1697_v19 = vrot.slane %v3099_v17, %v2421_v2  ;;  %v1158_v53 = vmul.f32 1.442695, %v1108_v6 }
  0xd0   : > { %v1047_v23 = vsub.f32 %v595_v0, %v3368_v57  ;;  %v1811_v0 = vsel %vm3108_vm10, %v2199_v7, 0.0  ;;  %vm1781_vm12 = vcmp.eq.f32.partialorder %v3062_v38, %v3370_v10  ;;  %v1110_v36 = vsub.f32 0.0, %v1078_v59 }
  0xd1   : > { %v1852_v24 = vsel %vm1834_vm0, %v1811_v0, 0.0  ;;  %v3373_v32 = vrot.slane %v3372_v60, %v2421_v2  ;;  %2214 = vpow2.f32 %v1156_v50  ;;  %v1160_v13 = vmul.f32 1.442695, %v1109_v8 }
  0xd2   : > { %v1079_v51 = vmul.f32 %v1047_v23, %v1047_v23  ;;  %v1854_v28 = vsel %vm1834_vm0, %v1812_v25, 0.0  ;;  %v1813_v54 = vsel %vm1781_vm12, %v2203_v35, 0.0  ;;  %v2205_v56 = vpop.eup %2204  ;;  %v1853_v23 = vadd.f32 %v1852_v24, %v1851_v44  ;;  %v3382_v24 = vld [vmem:[#allocation13_spill] sm:$0xff] }
  0xd3   : > { %v1276_v5 = vpop.permute.xlu1 %1275  ;;  %v602_v45 = vpop.permute.xlu0 %601  ;;  %v1162_v4 = vmul.f32 1.442695, %v1110_v36  ;;  %v3153_v42 = vrot.slane %v865_v55, %v2421_v2  ;;  %2216 = vpow2.f32 %v1158_v53  ;;  %v1856_v59 = vsel %vm1834_vm0, %v1813_v54, 0.0 }
  0xd4   : > { %v1048_v11 = vsub.f32 %v602_v45, %v3371_v41  ;;  %vm3131_vm13 = vcmp.eq.f32.partialorder %v1276_v5, %v3373_v32  ;;  %v1111_v1 = vsub.f32 0.0, %v1079_v51  ;;  %v3377_v5 = vrot.slane %v3376_v39, %v2421_v2  ;;  %v2207_v34 = vpop.eup %2206  ;;  %v3167_v51 = vld [vmem:[%s2604_s10 + $0x18] sm:$0xff]  ;;  %s2250_s10 = scalar_lea.vmem %s2249_s9, 256 }
  0xd5   : > { %v1814_v38 = vsel %vm3131_vm13, %v2205_v56, 0.0  ;;  %v3381_v7 = vrot.slane %v2895_v26, %v2421_v2  ;;  %2218 = vpow2.f32 %v1160_v13  ;;  %v1560_v10 = vcombine.high %v3099_v17, %v3099_v17  ;;  %p2252_p2 = scmp.lt.s32.totalorder %s2250_s10, %s2244_s29 }
  0xd6   : > { %v1080_v47 = vmul.f32 %v1048_v11, %v1048_v11  ;;  %v1164_v55 = vmul.f32 1.442695, %v1111_v1  ;;  %v1858_v33 = vsel %vm1834_vm0, %v1814_v38, 0.0  ;;  %2220 = vpow2.f32 %v1162_v4 }
  0xd7   : > { %v1283_v9 = vpop.permute.xlu1 %1282  ;;  %v609_v43 = vpop.permute.xlu0 %608  ;;  %v3195_v38 = vrot.slane %v1560_v10, %v2421_v2  ;;  %p2253_p3 = por %p2252_p2, %p2251_p1 }
  0xd8   : > { %v1049_v31 = vsub.f32 %v609_v43, %v2900_v14  ;;  %vm3143_vm14 = vcmp.eq.f32.partialorder %v1283_v9, %v3377_v5  ;;  %v3380_v14 = vrot.slane %v2884_v12, %v2421_v2  ;;  %v1112_v50 = vsub.f32 0.0, %v1080_v47  ;;  %v2209_v8 = vpop.eup %2208 }
  0xd9   : > { %v1815_v49 = vsel %vm3143_vm14, %v2207_v34, 0.0  ;;  %v2211_v36 = vpop.eup %2210  ;;  %2222 = vpow2.f32 %v1164_v55  ;;  %p2254_p5 = pnand %p2253_p3, %p2247_p0 }
  0xda   : > { %v1081_v9 = vmul.f32 %v1049_v31, %v1049_v31  ;;  %v1860_v41 = vsel %vm1834_vm0, %v1815_v49, 0.0  ;;  %v1166_v32 = vmul.f32 1.442695, %v1112_v50  ;;  %v1568_v31 = vrot.slane %v3167_v51, %v2583_v27 }
  0xdb   : > { %v1290_v3 = vpop.permute.xlu1 %1289  ;;  %v616_v40 = vpop.permute.xlu0 %615 }
  0xdc   : > { %v1050_v43 = vsub.f32 %v616_v40, %v3380_v14  ;;  %v1855_v40 = vadd.f32 %v1854_v28, %v1853_v23  ;;  %vm1784_vm15 = vcmp.eq.f32.partialorder %v1290_v3, %v2909_v46  ;;  %v1113_v11 = vsub.f32 0.0, %v1081_v9  ;;  %v3383_v28 = vld [vmem:[#allocation12_spill] sm:$0xff] }
  0xdd   : > { %v1816_v35 = vsel %vm1784_vm15, %v2209_v8, 0.0  ;;  %v3384_v54 = vrot.slane %v3383_v28, %v2421_v2  ;;  %2224 = vpow2.f32 %v1166_v32  ;;  %v1576_v8 = vcombine.high %v1568_v31, %v1568_v31 }
  0xde   : > { %v1082_v0 = vmul.f32 %v1050_v43, %v1050_v43  ;;  %v1857_v25 = vadd.f32 %v1856_v59, %v1855_v40  ;;  %v1862_v13 = vsel %vm1834_vm0, %v1816_v35, 0.0  ;;  %v1168_v1 = vmul.f32 1.442695, %v1113_v11 }
  0xdf   : > { %v1297_v45 = vpop.permute.xlu1 %1296  ;;  %v623_v48 = vpop.permute.xlu0 %622  ;;  %v3387_v43 = vrot.slane %v2928_v58, %v2421_v2 }
  0xe0   : > { %v1051_v63 = vsub.f32 %v623_v48, %v3381_v7  ;;  %v1859_v53 = vadd.f32 %v1858_v33, %v1857_v25  ;;  %vm1785_vm1 = vcmp.eq.f32.partialorder %v1297_v45, %v3382_v24  ;;  %v1114_v20 = vsub.f32 0.0, %v1082_v0  ;;  %v2213_v45 = vpop.eup %2212 }
  0xe1   : > { %v1817_v47 = vsel %vm1785_vm1, %v2211_v36, 0.0  ;;  %v2215_v59 = vpop.eup %2214  ;;  %2226 = vpow2.f32 %v1168_v1 }
  0xe2   : > { %v1083_v46 = vmul.f32 %v1051_v63, %v1051_v63  ;;  %v1861_v48 = vadd.f32 %v1860_v41, %v1859_v53  ;;  %v1170_v7 = vmul.f32 1.442695, %v1114_v20  ;;  %v1864_v63 = vsel %vm1834_vm0, %v1817_v47, 0.0  ;;  %v2217_v33 = vpop.eup %2216 }
  0xe3   : > { %v1304_v12 = vpop.permute.xlu1 %1303  ;;  %v630_v6 = vpop.permute.xlu0 %629  ;;  %v1561_v41 = vcombine.high %v3167_v51, %v3167_v51 }
  0xe4   : > { %v1052_v26 = vsub.f32 %v630_v6, %v2950_v62  ;;  %v1558_v62 = vcombine.high %v3016_v30, %v3016_v30  ;;  %vm3180_vm2 = vcmp.eq.f32.partialorder %v1304_v12, %v3384_v54  ;;  %v1115_v39 = vsub.f32 0.0, %v1083_v46  ;;  %v2219_v25 = vpop.eup %2218 }
  0xe5   : > { %v1863_v9 = vadd.f32 %v1862_v13, %v1861_v48  ;;  %v1818_v58 = vsel %vm3180_vm2, %v2213_v45, 0.0  ;;  %2228 = vpow2.f32 %v1170_v7  ;;  %v1584_v48 = vrot.slane %v1568_v31, %v2583_v27 }
  0xe6   : > { %v3198_v34 = vrot.slane %v1558_v62, %v2421_v2  ;;  %v1866_v50 = vsel %vm1834_vm0, %v1818_v58, 0.0 }
  0xe7   : > { %v1311_v3 = vpop.permute.xlu1 %1310  ;;  %v637_v44 = vpop.permute.xlu0 %636 }
  0xe8   : > { %v1053_v60 = vsub.f32 %v637_v44, %v2960_v22  ;;  %v1084_v22 = vmul.f32 %v1052_v26, %v1052_v26  ;;  %vm3187_vm3 = vcmp.eq.f32.partialorder %v1311_v3, %v3387_v43  ;;  %v1865_v26 = vadd.f32 %v1864_v63, %v1863_v9  ;;  %v2221_v44 = vpop.eup %2220 }
  0xe9   : > { %v1819_v6 = vsel %vm3187_vm3, %v2215_v59, 0.0  ;;  %v2223_v13 = vpop.eup %2222  ;;  %v1606_v59 = vcombine.high %v1584_v48, %v1584_v48 }
  0xea   : > { %v1085_v5 = vmul.f32 %v1053_v60, %v1053_v60  ;;  %v1116_v12 = vsub.f32 0.0, %v1084_v22  ;;  %v1868_v35 = vsel %vm1834_vm0, %v1819_v6, 0.0  ;;  %v1867_v36 = vadd.f32 %v1866_v50, %v1865_v26  ;;  %v2225_v43 = vpop.eup %2224 }
  0xeb   : > { %v1318_v57 = vpop.permute.xlu1 %1317  ;;  %v644_v14 = vpop.permute.xlu0 %643  ;;  %v1717_v50 = vrot.slane %v1606_v59, %v2421_v2 }
  0xec   : > { %v1054_v4 = vsub.f32 %v644_v14, %v981_v16  ;;  %vm1788_vm4 = vcmp.eq.f32.partialorder %v1318_v57, %v2969_v37  ;;  %v1172_v16 = vmul.f32 1.442695, %v1115_v39  ;;  %v1117_v40 = vsub.f32 0.0, %v1085_v5 }
  0xed   : > { %v1820_v10 = vsel %vm1788_vm4, %v2217_v33, 0.0  ;;  %v1174_v11 = vmul.f32 1.442695, %v1116_v12  ;;  %v1869_v32 = vadd.f32 %v1868_v35, %v1867_v36 }
  0xee   : > { %v1086_v15 = vmul.f32 %v1054_v4, %v1054_v4  ;;  %2230 = vpow2.f32 %v1172_v16  ;;  %v1176_v29 = vmul.f32 1.442695, %v1117_v40  ;;  %v1870_v37 = vsel %vm1834_vm0, %v1820_v10, 0.0 }
  0xef   : > { %v1325_v49 = vpop.permute.xlu1 %1324  ;;  %v651_v55 = vpop.permute.xlu0 %650  ;;  %2232 = vpow2.f32 %v1174_v11 }
  0xf0   : > { %vm1789_vm5 = vcmp.eq.f32.partialorder %v1325_v49, %v3001_v52  ;;  %v1055_v0 = vsub.f32 %v651_v55, %v985_v61  ;;  %v1118_v46 = vsub.f32 0.0, %v1086_v15  ;;  %v1598_v52 = vrot.slane %v1576_v8, %v2583_v27 }
  0xf1   : > { %v1821_v61 = vsel %vm1789_vm5, %v2219_v25, 0.0  ;;  %2234 = vpow2.f32 %v1176_v29 }
  0xf2   : > { %v1087_v3 = vmul.f32 %v1055_v0, %v1055_v0  ;;  %v1178_v28 = vmul.f32 1.442695, %v1118_v46  ;;  %v1872_v54 = vsel %vm1834_vm0, %v1821_v61, 0.0  ;;  %v1713_v57 = vrot.slane %v1598_v52, %v2421_v2 }
  0xf3   : > { %v1332_v53 = vpop.permute.xlu1 %1331  ;;  %v658_v24 = vpop.permute.xlu0 %657  ;;  %v1608_v14 = vcombine.high %v1598_v52, %v1598_v52 }
  0xf4   : > { %v1119_v60 = vsub.f32 0.0, %v1087_v3  ;;  %vm3222_vm6 = vcmp.eq.f32.partialorder %v1332_v53, %v1693_v18  ;;  %v1056_v62 = vsub.f32 %v658_v24, %v3045_v21  ;;  %v1871_v18 = vadd.f32 %v1870_v37, %v1869_v32 }
  0xf5   : > { %v1822_v20 = vsel %vm3222_vm6, %v2221_v44, 0.0  ;;  %v1575_v21 = vrot.slane %v1561_v41, %v2583_v27  ;;  %2236 = vpow2.f32 %v1178_v28  ;;  %v1721_v33 = vrot.slane %v1608_v14, %v2421_v2 }
  0xf6   : > { %v1088_v30 = vmul.f32 %v1056_v62, %v1056_v62  ;;  %v1180_v56 = vmul.f32 1.442695, %v1119_v60  ;;  %v1874_v1 = vsel %vm1834_vm0, %v1822_v20, 0.0  ;;  %v1873_v39 = vadd.f32 %v1872_v54, %v1871_v18 }
  0xf7   : > { %v1339_v22 = vpop.permute.xlu1 %1338  ;;  %v665_v45 = vpop.permute.xlu0 %664  ;;  %v1577_v17 = vcombine.high %v1575_v21, %v1575_v21 }
  0xf8   : > { %v1120_v47 = vsub.f32 0.0, %v1088_v30  ;;  %vm1791_vm7 = vcmp.eq.f32.partialorder %v1339_v22, %v1697_v19  ;;  %v1057_v31 = vsub.f32 %v665_v45, %v3153_v42  ;;  %2238 = vpow2.f32 %v1180_v56  ;;  %v2227_v19 = vpop.eup %2226 }
  0xf9   : > { %v1823_v5 = vsel %vm1791_vm7, %v2223_v13, 0.0  ;;  %v1875_v9 = vadd.f32 %v1874_v1, %v1873_v39  ;;  %v1709_v42 = vrot.slane %v1584_v48, %v2421_v2  ;;  %v2229_v40 = vpop.eup %2228 }
  0xfa   : > { %v1876_v23 = vsel %vm1834_vm0, %v1823_v5, 0.0  ;;  %v1089_v4 = vmul.f32 %v1057_v31, %v1057_v31  ;;  %v1182_v7 = vmul.f32 1.442695, %v1120_v47 }
  0xfb   : > { %v1353_v58 = vpop.permute.xlu1 %1352  ;;  %v1346_v63 = vpop.permute.xlu0 %1345  ;;  %v1877_v15 = vadd.f32 %v1876_v23, %v1875_v9 }
  0xfc   : > { %v1121_v12 = vsub.f32 0.0, %v1089_v4  ;;  %vm1793_vm8 = vcmp.eq.f32.partialorder %v1353_v58, %v3195_v38  ;;  %vm1792_vm9 = vcmp.eq.f32.partialorder %v1346_v63, %v3198_v34  ;;  %2240 = vpow2.f32 %v1182_v7  ;;  %v2231_v26 = vpop.eup %2230  ;;  %v1911_v7 = vld [vmem:[%s423_s13] sm:$0x3] }
  0xfd   : > { %v1825_v16 = vsel %vm1793_vm8, %v2227_v19, 0.0  ;;  %v1824_v6 = vsel %vm1792_vm9, %v2225_v43, 0.0  ;;  %v1605_v38 = vrot.slane %v1577_v17, %v2583_v27  ;;  %v1591_v34 = vrot.slane %v1575_v21, %v2583_v27  ;;  %v2233_v3 = vpop.eup %2232  ;;  %v1903_v58 = vld [vmem:[%s2578_s27] sm:$0xff] }
  0xfe   : > { %v1184_v49 = vmul.f32 1.442695, %v1121_v12  ;;  %v1878_v55 = vsel %vm1834_vm0, %v1824_v6, 0.0  ;;  %v1880_v10 = vsel %vm1834_vm0, %v1825_v16, 0.0  ;;  %v2235_v24 = vpop.eup %2234  ;;  %vm1912_vm3 = vnez %v1911_v7 }
  0xff   : > { %v1879_v0 = vadd.f32 %v1878_v55, %v1877_v15  ;;  %v1367_v8 = vpop.permute.xlu1 %1366  ;;  %v1360_v25 = vpop.permute.xlu0 %1359  ;;  %v1729_v61 = vrot.slane %v1605_v38, %v2421_v2  ;;  %v1725_v53 = vrot.slane %v1591_v34, %v2421_v2  ;;  %v1607_v27 = vcombine.high %v1591_v34, %v1591_v34 }
 0x100   : > { %2242 = vpow2.f32 %v1184_v49  ;;  %vm1795_vm10 = vcmp.eq.f32.partialorder %v1367_v8, %v1713_v57  ;;  %vm1794_vm11 = vcmp.eq.f32.partialorder %v1360_v25, %v1709_v42  ;;  %v1609_v60 = vcombine.high %v1605_v38, %v1605_v38 }
 0x101   : > { %v1827_v41 = vsel %vm1795_vm10, %v2231_v26, 0.0  ;;  %v1881_v11 = vadd.f32 %v1880_v10, %v1879_v0  ;;  %v1826_v35 = vsel %vm1794_vm11, %v2229_v40, 0.0  ;;  %v1733_v54 = vrot.slane %v1607_v27, %v2421_v2 }
 0x102   : > { %v1882_v46 = vsel %vm1834_vm0, %v1826_v35, 0.0  ;;  %v1884_v37 = vsel %vm1834_vm0, %v1827_v41, 0.0  ;;  %v2237_v52 = vpop.eup %2236  ;;  %v1737_v56 = vrot.slane %v1609_v60, %v2421_v2  ;;  %v2324_v19 = vmov 0  }
 0x103   : > { %v1883_v44 = vadd.f32 %v1882_v46, %v1881_v11  ;;  %v1381_v36 = vpop.permute.xlu1 %1380  ;;  %v1374_v29 = vpop.permute.xlu0 %1373  ;;  %v1913_v12 = vsel %vm1912_vm3, 16843009, %v2324_v19 }
 0x104   : > { %vm1797_vm12 = vcmp.eq.f32.partialorder %v1381_v36, %v1721_v33  ;;  %vm1796_vm13 = vcmp.eq.f32.partialorder %v1374_v29, %v1717_v50  ;;  %v1914_v42 = vunpack.c.0.s8 %v1913_v12 }
 0x105   : > { %v1829_v51 = vsel %vm1797_vm12, %v2235_v24, 0.0  ;;  %v1885_v62 = vadd.f32 %v1884_v37, %v1883_v44  ;;  %v1828_v32 = vsel %vm1796_vm13, %v2233_v3, 0.0  ;;  %v2239_v30 = vpop.eup %2238 }
 0x106   : > { %v1886_v20 = vsel %vm1834_vm0, %v1828_v32, 0.0  ;;  %v1888_v18 = vsel %vm1834_vm0, %v1829_v51, 0.0  ;;  %vm1915_vm4 = vcmp.ne.s32.totalorder %v1914_v42, 0 }
 0x107   : > { %v1887_v48 = vadd.f32 %v1886_v20, %v1885_v62  ;;  %v1395_v13 = vpop.permute.xlu1 %1394  ;;  %v1388_v28 = vpop.permute.xlu0 %1387 }
 0x108   : > { %vm1799_vm14 = vcmp.eq.f32.partialorder %v1395_v13, %v1729_v61  ;;  %vm1798_vm15 = vcmp.eq.f32.partialorder %v1388_v28, %v1725_v53 }
 0x109   : > { %v1831_v22 = vsel %vm1799_vm14, %v2239_v30, 0.0  ;;  %v1889_v45 = vadd.f32 %v1888_v18, %v1887_v48  ;;  %v1830_v21 = vsel %vm1798_vm15, %v2237_v52, 0.0  ;;  %v2241_v5 = vpop.eup %2240 }
 0x10a   : > { %v1890_v1 = vsel %vm1834_vm0, %v1830_v21, 0.0  ;;  %v1892_v57 = vsel %vm1834_vm0, %v1831_v22, 0.0 }
 0x10b   : > { %v1891_v47 = vadd.f32 %v1890_v1, %v1889_v45  ;;  %v1402_v31 = vpop.permute.xlu0 %1401  ;;  %v1409_v39 = vpop.permute.xlu1 %1408 }
 0x10c   : > { %vm1800_vm1 = vcmp.eq.f32.partialorder %v1402_v31, %v1733_v54  ;;  %vm1801_vm2 = vcmp.eq.f32.partialorder %v1409_v39, %v1737_v56 }
 0x10d   : > { %v2243_v2 = vpop.eup %2242  ;;  %v1893_v14 = vadd.f32 %v1892_v57, %v1891_v47  ;;  %v1832_v43 = vsel %vm1800_vm1, %v2241_v5, 0.0 }
 0x10e   : > { %v1894_v23 = vsel %vm1834_vm0, %v1832_v43, 0.0  ;;  %v1833_v4 = vsel %vm1801_vm2, %v2243_v2, 0.0 }
 0x10f   : > { %v1895_v59 = vadd.f32 %v1894_v23, %v1893_v14  ;;  %v1896_v9 = vsel %vm1834_vm0, %v1833_v4, 0.0 }
 0x111   : > { %v1897_v63 = vadd.f32 %v1896_v9, %v1895_v59 }
 0x113   : > { %v1904_v17 = vadd.f32 %v1903_v58, %v1897_v63 }
 0x115   : > { %1905 = vst.msk [vmem:[%s2578_s27] sm:$0xff] %vm1834_vm0, %v1904_v17 }
 0x11c   : > { %v1909_v15 = vld [vmem:[%s2578_s27] sm:$0xff] }
 0x11d   : > { %v1910_v16 = vmul.f32 0.03125, %v1909_v15 }
 0x11f   : > { %v1916_v6 = vsel %vm1915_vm4, 0.0, %v1910_v16 }
 0x120   : > { %1917 = vst.msk [vmem:[%s2578_s27] sm:$0xff] %vm1834_vm0, %v1916_v6 }
 0x121   : > { %2257 = shalt.err (!%p2254_p5)
}
 0x122   : > { %s2258_s27 = scalar_lea.hbm %s3274_s24, 128  ;;  %s2262_s11 = scalar_lea.hbm %s3323_s5, 512 }
 0x123   : > { %p2259_p6 = scmp.ne.s32.totalorder %s3274_s24, %s2258_s27  ;;  %p2263_p10 = scmp.lt.s32.totalorder %s3274_s24, %s3323_s5 }
 0x124   : > { %p2264_p11 = scmp.lt.s32.totalorder %s2262_s11, %s2258_s27 }
 0x125   : > { %p2260_p7 = pnand %p2259_p6, %p2396_p4 }
 0x126   : > { %p2265_p12 = por %p2264_p11, %p2263_p10 }
 0x127   : > { %p2261_p9 = pneg %p2260_p7 }
 0x129   : > { %p2266_p13 = pnand %p2265_p12, %p2261_p9 }
 0x12b   : > { %2269 = shalt.err (!%p2266_p13)
}
 0x12c   : > { %2114 = dma.vmem_to_hbm [thread:$0]  (%p2396_p4), %s1934_s14, 128, %s3274_s24, %s1919_s25  }
 0x12d PF: > { %p2120_p0 = scmp.ge.s32.totalorder %s2320_s23, 2  ;;  %s1945_s7 = sand.u32 1, %s2300_s18  }
 0x12e   : > { %s1946_s16 = scalar_lea.sflag [#allocation3], %s1945_s7 }
 0x12f   : > { %p2117_p1 = pnand %p2120_p0, %p2403_p8 }
 0x131   : > { %p2118_p2 = pneg %p2117_p1 }
 0x133   : > { %2295 = dma.done.wait (%p2118_p2), %s1946_s16, 128  }
 0x134   : > { %2297 = vsyncadd (%p2118_p2), %s1946_s16, 4294967168  ;;  %s18_s23 = sadd.s32 1, %s2320_s23   ;;  %s3392_s18 = smov %s2304_s19 }
 0x135   : > { %p15_p3 = scmp.ge.s32.totalorder %s18_s23, 6   ;;  %s3393_s19 = smov %s2308_s20 }
 0x136   : > { %s3394_s20 = smov %s2409_s6  ;;  %s3395_s21 = smov %s2316_s22 }
 0x137   : > { %s3396_s22 = smov %s3398_s26  ;;  %17 = sbr.rel (!%p15_p3) target bundleno = 4 (0x4), region = 95 }
 0x13c   :  { %1951 = vsyncpa [#allocation3], 1 }
 0x13d   :  { %1953 = vsyncpa [#allocation3 + $0x1], 1 }

</bundles_post_ra>
